<compile_context>
chip_gen: v6e
topology: v6e:2x2x1
jax: 0.10.0
libtpu: 0.0.40
codegen_flags: <defaults>
</compile_context>

<pallas_src>
import jax
import jax.numpy as jnp
from jax.experimental import pallas as pl
from jax.experimental.pallas import tpu as pltpu


LANES = 128


def _round_up_lanes(n, lanes=LANES):
    return ((n + lanes - 1) // lanes) * lanes


# --------------------------------------------------------------------------- #
# Kernel: one fused LSTM-cell step per grid point t.
# Operands: x_ref  (1, B, IP)  per-step input slice (pipelined over t)
#           h0_ref (B, HP)     initial hidden state (resident)
#           c0_ref (B, HP)     initial cell state (resident)
#           w_ref  (IP+HP, 4*HP) packed gate weights (resident)
#           b_ref  (B, 4*HP)   bias, pre-broadcast over batch (resident)
# Outputs:  h_ref, c_ref (B, HP) — resident accumulators, written back once.
# --------------------------------------------------------------------------- #
def encoder_seq_kernel(x_ref, h0_ref, c0_ref, w_ref, b_ref, h_ref, c_ref):
    @pl.when(pl.program_id(0) == 0)
    def _init():
        h_ref[...] = h0_ref[...]
        c_ref[...] = c0_ref[...]

    hp = h_ref.shape[1]            # lane-padded hidden width (multiple of 128)

    x = x_ref[0]                   # (B, IP)  float32
    h = h_ref[...]                 # (B, HP)  float32
    c = c_ref[...]                 # (B, HP)  float32

    # Linear(cat(x, h)) for all four gates in one MXU matmul.  x and h are both
    # lane-padded to multiples of 128, so the concat is vreg-aligned (no lane
    # shuffles) and each gate slice below is a full 128-lane span.
    xh = jnp.concatenate([x, h], axis=1).astype(w_ref.dtype)   # (B, IP+HP)
    gates = (jnp.dot(xh, w_ref[...], preferred_element_type=jnp.float32)
             + b_ref[...])                                     # (B, 4*HP) f32

    f = jax.nn.sigmoid(gates[:, 0 * hp:1 * hp])
    i = jax.nn.sigmoid(gates[:, 1 * hp:2 * hp])
    o = jax.nn.sigmoid(gates[:, 2 * hp:3 * hp])
    g = jnp.tanh(gates[:, 3 * hp:4 * hp])

    c_new = f * c + i * g
    h_new = o * jnp.tanh(c_new)

    c_ref[...] = c_new
    h_ref[...] = h_new


# --------------------------------------------------------------------------- #
# Parameter construction (PyTorch nn.Linear-style) and lane-padded packing.
# --------------------------------------------------------------------------- #
def init_params(key, input_size, hidden_size):
    """Init the 4 gate Linear layers in gate order (f, i, o, C).

    nn.Linear(in, out): weight (out, in) ~ U(-1/sqrt(in), 1/sqrt(in)), bias same.
    Returns [(w_g (H, I+H), b_g (H,)) for g in f,i,o,C].
    """
    in_features = input_size + hidden_size
    bound = 1.0 / (in_features ** 0.5)
    keys = jax.random.split(key, 8)
    params = []
    for g in range(4):
        w = jax.random.uniform(keys[2 * g], (hidden_size, in_features),
                               minval=-bound, maxval=bound, dtype=jnp.float32)
        b = jax.random.uniform(keys[2 * g + 1], (hidden_size,),
                               minval=-bound, maxval=bound, dtype=jnp.float32)
        params.append((w, b))
    return params


def pack_params(params, input_size, hidden_size, batch,
                param_dtype=jnp.float32):
    """Pack the four gate Linears into one lane-padded combined weight.

    Returns:
      w_packed: (IP + HP, 4*HP); rows [0:I] hold the x-part, rows [IP:IP+H] the
                h-part; gate g occupies lanes [g*HP : g*HP + H]; the rest zero.
      b_packed: (B, 4*HP) float32 bias, pre-broadcast over batch so no
                broadcast_in_dim is re-created inside the fused time loop.
    Padded lanes carry zero weight/bias, so padded state lanes stay exactly 0.
    """
    ip = _round_up_lanes(input_size)
    hp = _round_up_lanes(hidden_size)
    I, H = input_size, hidden_size

    w_packed = jnp.zeros((ip + hp, 4 * hp), jnp.float32)
    b_flat = jnp.zeros((4 * hp,), jnp.float32)
    for g, (w, bvec) in enumerate(params):
        wt = w.T                                   # (I+H, H)
        w_packed = w_packed.at[:I, g * hp:g * hp + H].set(wt[:I])
        w_packed = w_packed.at[ip:ip + H, g * hp:g * hp + H].set(wt[I:])
        b_flat = b_flat.at[g * hp:g * hp + H].set(bvec)
    b_packed = jnp.broadcast_to(b_flat[None, :], (batch, 4 * hp))
    # param_dtype=jnp.bfloat16 halves weight DMA bytes on v6e/v7x; keep f32
    # by default so the correctness tolerance stays tight on all generations.
    return w_packed.astype(param_dtype), b_packed.astype(jnp.float32)


# --------------------------------------------------------------------------- #
# Wrapper: fused Encoder.loop (and Encoder.forward when T == 1).
# --------------------------------------------------------------------------- #
def encoder_loop(inputs, h0, c0, w_packed, b_packed):
    """Run T fused LSTM-cell steps in a single pallas_call.

    inputs: (B, T, input_size) float32 (same layout as the PyTorch loop)
    h0, c0: (B, hidden_size) float32 initial states
    Returns the final (Hidden_State, Cell_State), each (B, hidden_size).
    """
    B, T, I = inputs.shape
    H = h0.shape[1]
    ip = _round_up_lanes(I)
    hp = _round_up_lanes(H)
    assert w_packed.shape == (ip + hp, 4 * hp)
    assert b_packed.shape == (B, 4 * hp)

    # (B,T,I) -> (T,B,I): each grid step's block is (1, B, IP) with batch on
    # the sublane axis and the lane-padded feature dim on the lane axis.
    x_seq = jnp.transpose(inputs.astype(jnp.float32), (1, 0, 2))
    x_seq = jnp.pad(x_seq, ((0, 0), (0, 0), (0, ip - I)))
    h0_pad = jnp.pad(h0.astype(jnp.float32), ((0, 0), (0, hp - H)))
    c0_pad = jnp.pad(c0.astype(jnp.float32), ((0, 0), (0, hp - H)))

    itemsize = jnp.dtype(w_packed.dtype).itemsize
    flops = T * (2 * B * (ip + hp) * 4 * hp + 10 * B * hp)
    transcendentals = T * 5 * B * hp
    bytes_accessed = (x_seq.size * 4 + w_packed.size * itemsize
                      + b_packed.size * 4 + (2 + 2) * B * hp * 4)

    h_pad, c_pad = pl.pallas_call(
        encoder_seq_kernel,
        out_shape=(jax.ShapeDtypeStruct((B, hp), jnp.float32),
                   jax.ShapeDtypeStruct((B, hp), jnp.float32)),
        grid=(T,),
        in_specs=[
            pl.BlockSpec((1, B, ip), lambda t: (t, 0, 0)),        # x_t slice
            pl.BlockSpec((B, hp), lambda t: (0, 0)),              # h0 (resident)
            pl.BlockSpec((B, hp), lambda t: (0, 0)),              # c0 (resident)
            pl.BlockSpec((ip + hp, 4 * hp), lambda t: (0, 0)),    # weights (resident)
            pl.BlockSpec((B, 4 * hp), lambda t: (0, 0)),          # bias (resident)
        ],
        out_specs=(pl.BlockSpec((B, hp), lambda t: (0, 0)),       # resident h acc
                   pl.BlockSpec((B, hp), lambda t: (0, 0))),      # resident c acc
        compiler_params=pltpu.CompilerParams(
            dimension_semantics=("arbitrary",)),                  # serial recurrence
        cost_estimate=pl.CostEstimate(flops=int(flops),
                                      transcendentals=int(transcendentals),
                                      bytes_accessed=int(bytes_accessed)),
    )(x_seq, h0_pad, c0_pad, w_packed, b_packed)

    return h_pad[:, :H], c_pad[:, :H]


# --------------------------------------------------------------------------- #
# Pure-JAX reference mirroring the PyTorch module exactly.
# --------------------------------------------------------------------------- #
def reference_loop(inputs, h0, c0, params):
    (wf, bf), (wi, bi), (wo, bo), (wc, bc) = params
    h, c = h0, c0
    T = inputs.shape[1]
    for t in range(T):
        xt = inputs[:, t, :]
        comb = jnp.concatenate([xt, h], axis=1)
        f = jax.nn.sigmoid(comb @ wf.T + bf)
        i = jax.nn.sigmoid(comb @ wi.T + bi)
        o = jax.nn.sigmoid(comb @ wo.T + bo)
        g = jnp.tanh(comb @ wc.T + bc)
        c = f * c + i * g
        h = o * jnp.tanh(c)
    return h, c


if __name__ == "__main__":
    batch, input_size, hidden_size, time_steps = 8, 16, 32, 12

    key = jax.random.PRNGKey(0)
    k_seq, k_h, k_c, k_p = jax.random.split(key, 4)

    inputs = jax.random.normal(k_seq, (batch, time_steps, input_size),
                               dtype=jnp.float32)
    params = init_params(k_p, input_size, hidden_size)
    w_packed, b_packed = pack_params(params, input_size, hidden_size, batch)

    # ---- Encoder.loop: full sequence, zero initial state (initHidden) ------
    h0 = jnp.zeros((batch, hidden_size), jnp.float32)
    c0 = jnp.zeros((batch, hidden_size), jnp.float32)
    h_T, c_T = encoder_loop(inputs, h0, c0, w_packed, b_packed)
    jax.block_until_ready((h_T, c_T))

    h_ref, c_ref = reference_loop(inputs, h0, c0, params)
    assert jnp.allclose(h_T, h_ref, atol=1e-4, rtol=1e-4)
    assert jnp.allclose(c_T, c_ref, atol=1e-4, rtol=1e-4)

    # ---- Encoder.forward: single step with a non-trivial carried state -----
    h_rand = jax.random.normal(k_h, (batch, hidden_size), dtype=jnp.float32)
    c_rand = jax.random.normal(k_c, (batch, hidden_size), dtype=jnp.float32)
    x1 = inputs[:, :1, :]
    h1, c1 = encoder_loop(x1, h_rand, c_rand, w_packed, b_packed)
    jax.block_until_ready((h1, c1))

    h1_ref, c1_ref = reference_loop(x1, h_rand, c_rand, params)
    assert jnp.allclose(h1, h1_ref, atol=1e-4, rtol=1e-4)
    assert jnp.allclose(c1, c1_ref, atol=1e-4, rtol=1e-4)

    print("KERNEL_OK")
</pallas_src>

<mosaic_0001>
module attributes {stable_mosaic.version = 11 : i64} {
  func.func @encoder_seq_kernel(%arg0: i32, %arg1: memref<1x8x128xf32, #tpu.memory_space<vmem>>, %arg2: memref<8x128xf32, #tpu.memory_space<vmem>>, %arg3: memref<8x128xf32, #tpu.memory_space<vmem>>, %arg4: memref<256x512xf32, #tpu.memory_space<vmem>>, %arg5: memref<8x512xf32, #tpu.memory_space<vmem>>, %arg6: memref<8x128xf32, #tpu.memory_space<vmem>>, %arg7: memref<8x128xf32, #tpu.memory_space<vmem>>) attributes {dimension_semantics = [#tpu.dimension_semantics<arbitrary>], iteration_bounds = array<i64: 12>, scalar_prefetch = 0 : i64, scratch_operands = 0 : i64, tpu.core_type = #tpu.core_type<tc>, window_params = [{transform_indices = @transform_0, window_bounds = array<i64: 1, 8, 128>}, {pipeline_mode = #tpu.pipeline_mode<synchronous>, transform_indices = @transform_1, window_bounds = array<i64: 8, 128>}, {pipeline_mode = #tpu.pipeline_mode<synchronous>, transform_indices = @transform_2, window_bounds = array<i64: 8, 128>}, {pipeline_mode = #tpu.pipeline_mode<synchronous>, transform_indices = @transform_3, window_bounds = array<i64: 256, 512>}, {pipeline_mode = #tpu.pipeline_mode<synchronous>, transform_indices = @transform_4, window_bounds = array<i64: 8, 512>}, {pipeline_mode = #tpu.pipeline_mode<synchronous>, transform_indices = @transform_5, window_bounds = array<i64: 8, 128>}, {pipeline_mode = #tpu.pipeline_mode<synchronous>, transform_indices = @transform_6, window_bounds = array<i64: 8, 128>}]} {
    %c0_i32 = arith.constant 0 : i32
    %0 = arith.cmpi eq, %arg0, %c0_i32 : i32
    %1 = arith.extui %0 : i1 to i32
    %c0_i32_0 = arith.constant 0 : i32
    %2 = arith.cmpi ne, %1, %c0_i32_0 : i32
    scf.if %2 {
      %c0_18 = arith.constant 0 : index
      %c0_19 = arith.constant 0 : index
      %39 = vector.load %arg2[%c0_18, %c0_19] : memref<8x128xf32, #tpu.memory_space<vmem>>, vector<8x128xf32>
      %c0_20 = arith.constant 0 : index
      %c0_21 = arith.constant 0 : index
      %40 = vector.load %arg6[%c0_20, %c0_21] : memref<8x128xf32, #tpu.memory_space<vmem>>, vector<8x128xf32>
      tpu.vector_store %arg6[%c0_20, %c0_21], %39 {strides = array<i32>} : memref<8x128xf32, #tpu.memory_space<vmem>>, vector<8x128xf32>,
      %c0_22 = arith.constant 0 : index
      %c0_23 = arith.constant 0 : index
      %41 = vector.load %arg3[%c0_22, %c0_23] : memref<8x128xf32, #tpu.memory_space<vmem>>, vector<8x128xf32>
      %c0_24 = arith.constant 0 : index
      %c0_25 = arith.constant 0 : index
      %42 = vector.load %arg7[%c0_24, %c0_25] : memref<8x128xf32, #tpu.memory_space<vmem>>, vector<8x128xf32>
      tpu.vector_store %arg7[%c0_24, %c0_25], %41 {strides = array<i32>} : memref<8x128xf32, #tpu.memory_space<vmem>>, vector<8x128xf32>,
    } else {
    }
    %c0 = arith.constant 0 : index
    %c0_1 = arith.constant 0 : index
    %c0_2 = arith.constant 0 : index
    %3 = vector.load %arg1[%c0, %c0_1, %c0_2] : memref<1x8x128xf32, #tpu.memory_space<vmem>>, vector<1x8x128xf32>
    %4 = vector.shape_cast %3 : vector<1x8x128xf32> to vector<8x128xf32>
    %c0_3 = arith.constant 0 : index
    %c0_4 = arith.constant 0 : index
    %5 = vector.load %arg6[%c0_3, %c0_4] : memref<8x128xf32, #tpu.memory_space<vmem>>, vector<8x128xf32>
    %c0_5 = arith.constant 0 : index
    %c0_6 = arith.constant 0 : index
    %6 = vector.load %arg7[%c0_5, %c0_6] : memref<8x128xf32, #tpu.memory_space<vmem>>, vector<8x128xf32>
    %7 = tpu.concatenate %4, %5 in 1 : vector<8x128xf32>, vector<8x128xf32> -> vector<8x256xf32>
    %c0_7 = arith.constant 0 : index
    %c0_8 = arith.constant 0 : index
    %8 = vector.load %arg4[%c0_7, %c0_8] : memref<256x512xf32, #tpu.memory_space<vmem>>, vector<256x512xf32>
    %cst = arith.constant dense<0.000000e+00> : vector<8x512xf32>
    %9 = tpu.matmul %7, %8, %cst {dimension_numbers = #tpu.dot_dimension_numbers<[1], [0], [0], [1], [0, 0, 1, 1], [], []>} : vector<8x256xf32>, vector<256x512xf32>, vector<8x512xf32> -> vector<8x512xf32>
    %c0_9 = arith.constant 0 : index
    %c0_10 = arith.constant 0 : index
    %10 = vector.load %arg5[%c0_9, %c0_10] : memref<8x512xf32, #tpu.memory_space<vmem>>, vector<8x512xf32>
    %11 = arith.addf %9, %10 : vector<8x512xf32>
    %12 = vector.extract_strided_slice %11 {offsets = [0, 0], sizes = [8, 128], strides = [1, 1]} : vector<8x512xf32> to vector<8x128xf32>
    %13 = arith.negf %12 : vector<8x128xf32>
    %14 = math.exp %13 : vector<8x128xf32>
    %cst_11 = arith.constant 1.000000e+00 : f32
    %15 = vector.broadcast %cst_11 : f32 to vector<8x128xf32>
    %16 = arith.addf %15, %14 : vector<8x128xf32>
    %17 = arith.divf %15, %16 : vector<8x128xf32>
    %18 = vector.extract_strided_slice %11 {offsets = [0, 128], sizes = [8, 128], strides = [1, 1]} : vector<8x512xf32> to vector<8x128xf32>
    %19 = arith.negf %18 : vector<8x128xf32>
    %20 = math.exp %19 : vector<8x128xf32>
    %cst_12 = arith.constant 1.000000e+00 : f32
    %21 = vector.broadcast %cst_12 : f32 to vector<8x128xf32>
    %22 = arith.addf %21, %20 : vector<8x128xf32>
    %23 = arith.divf %21, %22 : vector<8x128xf32>
    %24 = vector.extract_strided_slice %11 {offsets = [0, 256], sizes = [8, 128], strides = [1, 1]} : vector<8x512xf32> to vector<8x128xf32>
    %25 = arith.negf %24 : vector<8x128xf32>
    %26 = math.exp %25 : vector<8x128xf32>
    %cst_13 = arith.constant 1.000000e+00 : f32
    %27 = vector.broadcast %cst_13 : f32 to vector<8x128xf32>
    %28 = arith.addf %27, %26 : vector<8x128xf32>
    %29 = arith.divf %27, %28 : vector<8x128xf32>
    %30 = vector.extract_strided_slice %11 {offsets = [0, 384], sizes = [8, 128], strides = [1, 1]} : vector<8x512xf32> to vector<8x128xf32>
    %31 = math.tanh %30 : vector<8x128xf32>
    %32 = arith.mulf %17, %6 : vector<8x128xf32>
    %33 = arith.mulf %23, %31 : vector<8x128xf32>
    %34 = arith.addf %32, %33 : vector<8x128xf32>
    %35 = math.tanh %34 : vector<8x128xf32>
    %36 = arith.mulf %29, %35 : vector<8x128xf32>
    %c0_14 = arith.constant 0 : index
    %c0_15 = arith.constant 0 : index
    %37 = vector.load %arg7[%c0_14, %c0_15] : memref<8x128xf32, #tpu.memory_space<vmem>>, vector<8x128xf32>
    tpu.vector_store %arg7[%c0_14, %c0_15], %34 {strides = array<i32>} : memref<8x128xf32, #tpu.memory_space<vmem>>, vector<8x128xf32>,
    %c0_16 = arith.constant 0 : index
    %c0_17 = arith.constant 0 : index
    %38 = vector.load %arg6[%c0_16, %c0_17] : memref<8x128xf32, #tpu.memory_space<vmem>>, vector<8x128xf32>
    tpu.vector_store %arg6[%c0_16, %c0_17], %36 {strides = array<i32>} : memref<8x128xf32, #tpu.memory_space<vmem>>, vector<8x128xf32>,
    return
  }
  func.func @transform_0(%arg0: i32) -> (i32, i32, i32) {
    %c0_i32 = arith.constant 0 : i32
    %c0_i32_0 = arith.constant 0 : i32
    %c0_i32_1 = arith.constant 0 : i32
    return %arg0, %c0_i32, %c0_i32_0 : i32, i32, i32
  }
  func.func @transform_1(%arg0: i32) -> (i32, i32) {
    %c0_i32 = arith.constant 0 : i32
    %c0_i32_0 = arith.constant 0 : i32
    %c0_i32_1 = arith.constant 0 : i32
    return %c0_i32, %c0_i32_0 : i32, i32
  }
  func.func @transform_2(%arg0: i32) -> (i32, i32) {
    %c0_i32 = arith.constant 0 : i32
    %c0_i32_0 = arith.constant 0 : i32
    %c0_i32_1 = arith.constant 0 : i32
    return %c0_i32, %c0_i32_0 : i32, i32
  }
  func.func @transform_3(%arg0: i32) -> (i32, i32) {
    %c0_i32 = arith.constant 0 : i32
    %c0_i32_0 = arith.constant 0 : i32
    %c0_i32_1 = arith.constant 0 : i32
    return %c0_i32, %c0_i32_0 : i32, i32
  }
  func.func @transform_4(%arg0: i32) -> (i32, i32) {
    %c0_i32 = arith.constant 0 : i32
    %c0_i32_0 = arith.constant 0 : i32
    %c0_i32_1 = arith.constant 0 : i32
    return %c0_i32, %c0_i32_0 : i32, i32
  }
  func.func @transform_5(%arg0: i32) -> (i32, i32) {
    %c0_i32 = arith.constant 0 : i32
    %c0_i32_0 = arith.constant 0 : i32
    %c0_i32_1 = arith.constant 0 : i32
    return %c0_i32, %c0_i32_0 : i32, i32
  }
  func.func @transform_6(%arg0: i32) -> (i32, i32) {
    %c0_i32 = arith.constant 0 : i32
    %c0_i32_0 = arith.constant 0 : i32
    %c0_i32_1 = arith.constant 0 : i32
    return %c0_i32, %c0_i32_0 : i32, i32
  }
}

</mosaic_0001>

<bundles_post_ra>
// kernel: tpu_custom_call.1
= control target key start
LH: loop header
LB: loop body
LE: loop exit
PB: predicated region body
PF: predicated region fallthrough
CT: control target
= control target key end

     0   :  { %12 = vsyncpa [#allocation3], 0  ;;  %s1338_s0 = inlined_call_operand.hbm [shape: f32[12,8,128], index: 0, kind: input, shape index: {}]   ;;  %s1339_s1 = inlined_call_operand.hbm [shape: f32[8,128], index: 1, kind: input, shape index: {}]   ;;  %s1340_s2 = inlined_call_operand.hbm [shape: f32[8,128], index: 2, kind: input, shape index: {}]   ;;  %s1341_s3 = inlined_call_operand.hbm [shape: f32[256,512], index: 3, kind: input, shape index: {}]   ;;  %s1342_s4 = inlined_call_operand.hbm [shape: f32[8,512], index: 4, kind: input, shape index: {}]   ;;  %s1343_s5 = inlined_call_operand.hbm [shape: f32[8,128], index: 5, kind: output, shape index: {0}]   ;;  %s1344_s6 = inlined_call_operand.hbm [shape: f32[8,128], index: 6, kind: output, shape index: {1}]  }
   0x1   :  { %14 = vsyncpa [#allocation3 + $0x1], 0 }
   0x2   :  { %15 = vsyncpa [#allocation6], 0 }
   0x3   :  { %16 = vsyncpa [#allocation9], 0 }
   0x4   :  { %17 = vsyncpa [#allocation4], 0 }
   0x5   :  { %18 = vsyncpa [#allocation13], 0  ;;  %s1147_s21 = smov 0   ;;  %s1149_s22 = smov 0  }
   0x6   :  { %s1151_s23 = smov 0   ;;  %s1153_s24 = smov 0  }
   0x7 LB: > { %s1103_s25 = smov [#allocation5]   ;;  %s1168_s27 = sadd.s32 4294967295, %s1101_s24   ;;  %s1101_s24 = sphi %s1153_s24, %s1362_s24   ;;  %s1097_s23 = sphi %s1151_s23, %s1361_s23   ;;  %s1093_s22 = sphi %s1149_s22, %s1360_s22   ;;  %s1089_s21 = sphi %s1147_s21, %s1359_s21  }
   0x8   : > { %s194_s26 = sshll.u32 %s1103_s25, 4  ;;  %p735_p0 = scmp.ge.s32.totalorder %s1101_s24, 1  ;;  %s195_s26 = int_to_ptr.vmem [resolvable:$true] %s194_s26 }
   0x9   : > { %p1345_p1 = scmp.eq.s32.totalorder %s1168_s27, 0  ;;  %p181_p2 = scmp.lt.s32.totalorder %s1101_s24, 13 }
   0xa   : > { %s1104_s29 = smov [#allocation8]   ;;  %s1105_s8 = smov [#allocation7]  }
   0xb   : > { %p1174_p4 = pnand %p735_p0, %p181_p2  ;;  %s215_s30 = sshll.u32 %s1104_s29, 4  ;;  %s1180_s30 = int_to_ptr.vmem [resolvable:$true] %s215_s30 }
   0xc   : > { %s205_s9 = sshll.u32 %s1105_s8, 4  ;;  %s882_s10 = scalar_lea.vmem %s195_s26, 128  ;;  %s1188_s9 = int_to_ptr.vmem [resolvable:$true] %s205_s9 }
   0xd   : > { %s1348_s28 = scalar_select %p1174_p4, 1, 0 }
   0xe   : > { %p785_p5 = pneg %p1174_p4  ;;  %p883_p8 = scmp.ne.s32.totalorder %s195_s26, %s882_s10 }
   0xf   : > { %p890_p11 = scmp.lt.s32.totalorder %s195_s26, %s195_s26  ;;  %p891_p12 = scmp.lt.s32.totalorder %s882_s10, %s882_s10 }
  0x10   : > { %p1184_p6 = pnand %p785_p5, %p1345_p1 }
  0x11   : > { %p892_p13 = por %p891_p12, %p890_p11 }
  0x12   : > { %p873_p7 = pneg %p1184_p6 }
  0x14   : > { %p885_p9 = pnand %p883_p8, %p873_p7 }
  0x16   : > { %p886_p10 = pneg %p885_p9 }
  0x18   : > { %p893_p0 = pnand %p892_p13, %p886_p10 }
  0x1a   : > { %896 = shalt.err (!%p893_p0)
}
  0x1b   : > { %788 = dma.hbm_to_vmem [thread:$0]  (!%p1184_p6), %s1339_s1, 128, %s195_s26, [#allocation6]  }
  0x1c   : > { %s908_s13 = scalar_lea.vmem %s1180_s30, 16384  ;;  %p916_p9 = scmp.lt.s32.totalorder %s1180_s30, %s1180_s30 }
  0x1d   : > { %p909_p2 = scmp.ne.s32.totalorder %s1180_s30, %s908_s13  ;;  %p917_p10 = scmp.lt.s32.totalorder %s908_s13, %s908_s13 }
  0x1f   : > { %p911_p5 = pnand %p909_p2, %p873_p7  ;;  %p918_p11 = por %p917_p10, %p916_p9 }
  0x21   : > { %p912_p8 = pneg %p911_p5 }
  0x23   : > { %p919_p12 = pnand %p918_p11, %p912_p8 }
  0x25   : > { %922 = shalt.err (!%p919_p12)
}
  0x26   : > { %s1106_s14 = smov 512   ;;  %s1107_s15 = smov 32  }
  0x27   : > { %794 = dma.hbm_to_vmem [thread:$0]  (!%p1184_p6), %s1341_s3, 16384, %s1180_s30, [#allocation9], %s1106_s14, %s1106_s14, %s1107_s15  }
  0x28   : > { %s934_s18 = scalar_lea.vmem %s1188_s9, 128  ;;  %p942_p5 = scmp.lt.s32.totalorder %s1188_s9, %s1188_s9 }
  0x29   : > { %p935_p13 = scmp.ne.s32.totalorder %s1188_s9, %s934_s18  ;;  %p943_p8 = scmp.lt.s32.totalorder %s934_s18, %s934_s18 }
  0x2b   : > { %p937_p0 = pnand %p935_p13, %p873_p7  ;;  %p944_p9 = por %p943_p8, %p942_p5 }
  0x2d   : > { %p938_p2 = pneg %p937_p0 }
  0x2f   : > { %p945_p10 = pnand %p944_p9, %p938_p2 }
  0x31   : > { %948 = shalt.err (!%p945_p10)
}
  0x32   : > { %791 = dma.hbm_to_vmem [thread:$0]  (!%p1184_p6), %s1340_s2, 128, %s1188_s9, [#allocation6]  }
  0x33   : > { %s1108_s25 = smov [#allocation10]  }
  0x34   : > { %s229_s26 = sshll.u32 %s1108_s25, 4  ;;  %s230_s26 = int_to_ptr.vmem [resolvable:$true] %s229_s26 }
  0x35   : > { %s960_s29 = scalar_lea.vmem %s230_s26, 512  ;;  %p968_p0 = scmp.lt.s32.totalorder %s230_s26, %s230_s26 }
  0x36   : > { %p961_p11 = scmp.ne.s32.totalorder %s230_s26, %s960_s29  ;;  %p969_p2 = scmp.lt.s32.totalorder %s960_s29, %s960_s29 }
  0x38   : > { %p963_p12 = pnand %p961_p11, %p873_p7  ;;  %p970_p5 = por %p969_p2, %p968_p0 }
  0x3a   : > { %p964_p13 = pneg %p963_p12 }
  0x3c   : > { %p971_p8 = pnand %p970_p5, %p964_p13 }
  0x3e   : > { %974 = shalt.err (!%p971_p8)
}
  0x3f   : > { %797 = dma.hbm_to_vmem [thread:$0]  (!%p1184_p6), %s1342_s4, 512, %s230_s26, [#allocation9]  }
  0x40   : > { %s1235_s9 = sadd.s32 1, %s1101_s24   ;;  %s31_s7 = sadd.s32 1, %s1097_s23 }
  0x41   : > { %s28_s10 = ssub.s32 %s1101_s24, %s1235_s9  ;;  %p38_p7 = scmp.ne.s32.totalorder %s1097_s23, %s1093_s22 }
  0x42   : > { %p29_p9 = scmp.eq.s32.totalorder %s28_s10, 0  ;;  %p39_p10 = scmp.eq.s32.totalorder %s1101_s24, 0 }
  0x43   : > { %p44_p11 = scmp.ne.s32.totalorder %s1093_s22, %s1089_s21  ;;  %p806_p12 = scmp.lt.s32.totalorder %s1101_s24, 12 }
  0x44   : > { %s1247_s11 = scalar_select %p29_p9, %s1097_s23, %s31_s7  }
  0x45   : > { %p40_p13 = por %p39_p10, %p38_p7  ;;  %p1251_p0 = por %p1345_p1, %p44_p11 }
  0x46   : > { %s240_s13 = sand.u32 1, %s1097_s23   ;;  %s742_s14 = sshll.u32 %s1101_s24, 7 }
  0x47   : > { %s1350_s12 = scalar_select %p1251_p0, 1, 0 }
  0x48   : > { %s741_s15 = sshll.u32 %s240_s13, 3  ;;  %s1260_s18 = scalar_lea.hbm %s1338_s0, %s742_s14 }
  0x49   : > { %s244_s21 = scalar_lea.vmem [#allocation2], %s741_s15  ;;  %p1262_p6 = pnand %p806_p12, %p40_p13 }
  0x4a   : > { %s251_s19 = sshll.u32 %s244_s21, 4  ;;  %s241_s25 = scalar_lea.sflag [#allocation3], %s240_s13  ;;  %s252_s19 = int_to_ptr.vmem [resolvable:$true] %s251_s19 }
  0x4b   : > { %s975_s26 = scalar_lea.hbm %s1260_s18, 128  ;;  %p977_p5 = pneg %p1262_p6 }
  0x4c   : > { %p976_p2 = scmp.ne.s32.totalorder %s1260_s18, %s975_s26  ;;  %s980_s30 = scalar_lea.hbm %s1338_s0, 1536 }
  0x4d   : > { %p981_p9 = scmp.lt.s32.totalorder %s1260_s18, %s1338_s0  ;;  %p982_p10 = scmp.lt.s32.totalorder %s980_s30, %s975_s26 }
  0x4e   : > { %p978_p8 = pnand %p977_p5, %p976_p2 }
  0x4f   : > { %p983_p11 = por %p982_p10, %p981_p9 }
  0x50   : > { %p979_p7 = pneg %p978_p8 }
  0x52   : > { %p984_p12 = pnand %p983_p11, %p979_p7 }
  0x54   : > { %987 = shalt.err (!%p984_p12)
}
  0x55   : > { %s988_s10 = scalar_lea.vmem %s252_s19, 128  ;;  %s1109_s13 = smov [#allocation2]  }
  0x56   : > { %p989_p13 = scmp.ne.s32.totalorder %s252_s19, %s988_s10  ;;  %s993_s14 = sshll.u32 %s1109_s13, 4  ;;  %s994_s14 = int_to_ptr.vmem [resolvable:$false] %s993_s14 }
  0x57   : > { %s995_s15 = scalar_lea.vmem %s994_s14, 256  ;;  %p996_p2 = scmp.lt.s32.totalorder %s252_s19, %s994_s14 }
  0x58   : > { %p991_p3 = pnand %p989_p13, %p977_p5  ;;  %p997_p8 = scmp.lt.s32.totalorder %s995_s15, %s988_s10 }
  0x5a   : > { %p992_p1 = pneg %p991_p3  ;;  %p998_p0 = por %p997_p8, %p996_p2 }
  0x5c   : > { %p999_p4 = pnand %p998_p0, %p992_p1 }
  0x5e   : > { %1002 = shalt.err (!%p999_p4)
}
  0x5f   : > { %801 = dma.hbm_to_vmem [thread:$0]  (!%p1262_p6), %s1260_s18, 128, %s252_s19, %s241_s25  }
  0x60   : > { %p1352_p7 = scmp.ne.s32.totalorder %s1348_s28, 0 }
  0x61   : > { %s262_s16 = sand.u32 (!%p1352_p7), 1, %s1093_s22   ;;  %p1353_p3 = scmp.ne.s32.totalorder (!%p1352_p7), %s1350_s12, 0 }
  0x62   : > { %260 = sbr.rel (%p1352_p7) target bundleno = 440 (0x1b8), region = 40  ;;  %s1283_s17 = sshll.u32 (!%p1352_p7), %s262_s16, 3 }
  0x63   : > { %s263_s21 = scalar_lea.sflag (!%p1352_p7), [#allocation3], %s262_s16  ;;  %s266_s26 = scalar_lea.vmem (!%p1352_p7), [#allocation2], %s1283_s17 }
  0x67   : > { %1068 = dma.done.wait (%p1353_p3), %s263_s21, 128  }
  0x68   : > { %1070 = vsyncadd (%p1353_p3), %s263_s21, 4294967168  ;;  %p1354_p1 = scmp.eq.s32.totalorder %s1168_s27, 0 }
  0x6a   : > { %1072 = dma.done.wait (%p1354_p1), [#allocation6], 256   ;;  %p1355_p4 = pmov %p1354_p1 }
  0x6b   : > { %p1356_p0 = pmov %p1354_p1 }
  0x6c   : > { %1074 = vsyncadd (%p1355_p4), [#allocation6], 4294967040 }
  0x6d   : > { %1076 = dma.done.wait (%p1356_p0), [#allocation9], 16896   ;;  %p1357_p6 = pmov %p1356_p0 }
  0x6e   : > { %p1358_p5 = scmp.ne.s32.totalorder %s1168_s27, 0 }
  0x6f   : > { %1078 = vsyncadd (%p1357_p6), [#allocation9], 4294950400 }
  0x70   : > { %309 = sbr.rel (%p1358_p5) target bundleno = 119 (0x77), region = 64 }
  0x75   : > { %v310_v0 = vld [vmem:[#allocation5] sm:$0xff]  ;;  %v312_v1 = vld [vmem:[#allocation7] sm:$0xff] }
  0x76   : > { %311 = vst [vmem:[#allocation11] sm:$0xff] %v310_v0  ;;  %313 = vst [vmem:[#allocation12] sm:$0xff] %v312_v1 }
  0x77 PF: > { %v378_v2 = vld [vmem:[#allocation8 + $0x1e8] sm:$0xff]  ;;  %v377_v3 = vld [vmem:[#allocation8 + $0x1e0] sm:$0xff]  ;;  %v380_v10 = vld [vmem:[#allocation8 + $0x1f8] sm:$0xff]  ;;  %s1110_s28 = smov [#allocation12]   ;;  %p811_p9 = scmp.eq.s32.totalorder %s1168_s27, 11 }
  0x78   : > { %v374_v4 = vld [vmem:[#allocation8 + $0x1c8] sm:$0xff]  ;;  %449 = vmatprep.subr.mxu0 %v378_v2  ;;  %v373_v5 = vld [vmem:[#allocation8 + $0x1c0] sm:$0xff]  ;;  %520 = vmatprep.subr.mxu1 %v380_v10  ;;  %v379_v12 = vld [vmem:[#allocation8 + $0x1f0] sm:$0xff]  ;;  %s635_s12 = sshll.u32 %s1110_s28, 4  ;;  %s636_s12 = int_to_ptr.vmem [resolvable:$true] %s635_s12 }
  0x79   : > { %450 = vmatpush1.msra.mxu0 %v377_v3  ;;  %v370_v6 = vld [vmem:[#allocation8 + $0x1a8] sm:$0xff]  ;;  %v369_v7 = vld [vmem:[#allocation8 + $0x1a0] sm:$0xff]  ;;  %521 = vmatpush1.msra.mxu1 %v379_v12  ;;  %v376_v14 = vld [vmem:[#allocation8 + $0x1d8] sm:$0xff]  ;;  %s1003_s18 = scalar_lea.vmem %s636_s12, 128  ;;  %p1010_p13 = scmp.lt.s32.totalorder %s636_s12, %s636_s12 }
  0x7a   : > { %451 = vmatprep.subr.mxu0 %v374_v4  ;;  %v366_v8 = vld [vmem:[#allocation8 + $0x188] sm:$0xff]  ;;  %v365_v9 = vld [vmem:[#allocation8 + $0x180] sm:$0xff]  ;;  %v375_v15 = vld [vmem:[#allocation8 + $0x1d0] sm:$0xff]  ;;  %522 = vmatprep.subr.mxu1 %v376_v14  ;;  %p1004_p10 = scmp.ne.s32.totalorder %s636_s12, %s1003_s18  ;;  %p1011_p2 = scmp.lt.s32.totalorder %s1003_s18, %s1003_s18 }
  0x7b   : > { %452 = vmatpush1.msra.mxu0 %v373_v5  ;;  %v362_v11 = vld [vmem:[#allocation8 + $0x168] sm:$0xff]  ;;  %v361_v13 = vld [vmem:[#allocation8 + $0x160] sm:$0xff]  ;;  %v372_v17 = vld [vmem:[#allocation8 + $0x1b8] sm:$0xff]  ;;  %523 = vmatpush1.msra.mxu1 %v375_v15 }
  0x7c   : > { %453 = vmatprep.subr.mxu0 %v370_v6  ;;  %v358_v16 = vld [vmem:[#allocation8 + $0x148] sm:$0xff]  ;;  %v357_v18 = vld [vmem:[#allocation8 + $0x140] sm:$0xff]  ;;  %v371_v19 = vld [vmem:[#allocation8 + $0x1b0] sm:$0xff]  ;;  %524 = vmatprep.subr.mxu1 %v372_v17  ;;  %p1005_p11 = pnand %p1004_p10, %p811_p9  ;;  %p1012_p8 = por %p1011_p2, %p1010_p13 }
  0x7d   : > { %454 = vmatpush1.msra.mxu0 %v369_v7  ;;  %v368_v20 = vld [vmem:[#allocation8 + $0x198] sm:$0xff]  ;;  %v354_v21 = vld [vmem:[#allocation8 + $0x128] sm:$0xff]  ;;  %v367_v22 = vld [vmem:[#allocation8 + $0x190] sm:$0xff]  ;;  %525 = vmatpush1.msra.mxu1 %v371_v19 }
  0x7e   : > { %455 = vmatprep.subr.mxu0 %v366_v8  ;;  %v353_v23 = vld [vmem:[#allocation8 + $0x120] sm:$0xff]  ;;  %v364_v24 = vld [vmem:[#allocation8 + $0x178] sm:$0xff]  ;;  %v350_v25 = vld [vmem:[#allocation8 + $0x108] sm:$0xff]  ;;  %526 = vmatprep.subr.mxu1 %v368_v20  ;;  %p1006_p12 = pneg %p1005_p11 }
  0x7f   : > { %456 = vmatpush1.msra.mxu0 %v365_v9  ;;  %v363_v26 = vld [vmem:[#allocation8 + $0x170] sm:$0xff]  ;;  %v349_v27 = vld [vmem:[#allocation8 + $0x100] sm:$0xff]  ;;  %527 = vmatpush1.msra.mxu1 %v367_v22  ;;  %v360_v28 = vld [vmem:[#allocation8 + $0x158] sm:$0xff] }
  0x80   : > { %457 = vmatprep.subr.mxu0 %v362_v11  ;;  %v346_v29 = vld [vmem:[#allocation8 + $0xe8] sm:$0xff]  ;;  %528 = vmatprep.subr.mxu1 %v364_v24  ;;  %v359_v30 = vld [vmem:[#allocation8 + $0x150] sm:$0xff]  ;;  %v345_v31 = vld [vmem:[#allocation8 + $0xe0] sm:$0xff]  ;;  %p1013_p7 = pnand %p1012_p8, %p1006_p12 }
  0x81   : > { %458 = vmatpush1.msra.mxu0 %v361_v13  ;;  %529 = vmatpush1.msra.mxu1 %v363_v26  ;;  %v356_v32 = vld [vmem:[#allocation8 + $0x138] sm:$0xff]  ;;  %v342_v33 = vld [vmem:[#allocation8 + $0xc8] sm:$0xff]  ;;  %v355_v34 = vld [vmem:[#allocation8 + $0x130] sm:$0xff] }
  0x82   : > { %459 = vmatprep.subr.mxu0 %v358_v16  ;;  %530 = vmatprep.subr.mxu1 %v360_v28  ;;  %v341_v35 = vld [vmem:[#allocation8 + $0xc0] sm:$0xff]  ;;  %v352_v36 = vld [vmem:[#allocation8 + $0x118] sm:$0xff]  ;;  %v338_v37 = vld [vmem:[#allocation8 + $0xa8] sm:$0xff] }
  0x83   : > { %460 = vmatpush1.msra.mxu0 %v357_v18  ;;  %531 = vmatpush1.msra.mxu1 %v359_v30  ;;  %v351_v38 = vld [vmem:[#allocation8 + $0x110] sm:$0xff]  ;;  %v337_v39 = vld [vmem:[#allocation8 + $0xa0] sm:$0xff]  ;;  %v348_v40 = vld [vmem:[#allocation8 + $0xf8] sm:$0xff] }
  0x84   : > { %461 = vmatprep.subr.mxu0 %v354_v21  ;;  %532 = vmatprep.subr.mxu1 %v356_v32  ;;  %v334_v41 = vld [vmem:[#allocation8 + $0x88] sm:$0xff]  ;;  %v347_v42 = vld [vmem:[#allocation8 + $0xf0] sm:$0xff]  ;;  %v333_v43 = vld [vmem:[#allocation8 + $0x80] sm:$0xff] }
  0x85   : > { %462 = vmatpush1.msra.mxu0 %v353_v23  ;;  %533 = vmatpush1.msra.mxu1 %v355_v34  ;;  %v344_v44 = vld [vmem:[#allocation8 + $0xd8] sm:$0xff]  ;;  %v330_v45 = vld [vmem:[#allocation8 + $0x68] sm:$0xff]  ;;  %v343_v46 = vld [vmem:[#allocation8 + $0xd0] sm:$0xff] }
  0x86   : > { %463 = vmatprep.subr.mxu0 %v350_v25  ;;  %534 = vmatprep.subr.mxu1 %v352_v36  ;;  %v329_v47 = vld [vmem:[#allocation8 + $0x60] sm:$0xff]  ;;  %v340_v48 = vld [vmem:[#allocation8 + $0xb8] sm:$0xff]  ;;  %v326_v49 = vld [vmem:[#allocation8 + $0x48] sm:$0xff] }
  0x87   : > { %464 = vmatpush1.msra.mxu0 %v349_v27  ;;  %535 = vmatpush1.msra.mxu1 %v351_v38  ;;  %v339_v50 = vld [vmem:[#allocation8 + $0xb0] sm:$0xff]  ;;  %v325_v51 = vld [vmem:[#allocation8 + $0x40] sm:$0xff]  ;;  %v336_v52 = vld [vmem:[#allocation8 + $0x98] sm:$0xff] }
  0x88   : > { %465 = vmatprep.subr.mxu0 %v346_v29  ;;  %536 = vmatprep.subr.mxu1 %v348_v40  ;;  %v322_v53 = vld [vmem:[#allocation8 + $0x28] sm:$0xff]  ;;  %v335_v54 = vld [vmem:[#allocation8 + $0x90] sm:$0xff]  ;;  %v321_v55 = vld [vmem:[#allocation8 + $0x20] sm:$0xff] }
  0x89   : > { %466 = vmatpush1.msra.mxu0 %v345_v31  ;;  %537 = vmatpush1.msra.mxu1 %v347_v42  ;;  %v332_v56 = vld [vmem:[#allocation8 + $0x78] sm:$0xff]  ;;  %v318_v57 = vld [vmem:[#allocation8 + $0x8] sm:$0xff]  ;;  %v331_v58 = vld [vmem:[#allocation8 + $0x70] sm:$0xff] }
  0x8a   : > { %467 = vmatprep.subr.mxu0 %v342_v33  ;;  %538 = vmatprep.subr.mxu1 %v344_v44  ;;  %v317_v59 = vld [vmem:[#allocation8] sm:$0xff]  ;;  %v328_v60 = vld [vmem:[#allocation8 + $0x58] sm:$0xff]  ;;  %v442_v61 = vld [vmem:[#allocation8 + $0x3e8] sm:$0xff] }
  0x8b   : > { %468 = vmatpush1.msra.mxu0 %v341_v35  ;;  %539 = vmatpush1.msra.mxu1 %v343_v46  ;;  %v327_v62 = vld [vmem:[#allocation8 + $0x50] sm:$0xff]  ;;  %v441_v63 = vld [vmem:[#allocation8 + $0x3e0] sm:$0xff]  ;;  %v324_v0 = vld [vmem:[#allocation8 + $0x38] sm:$0xff] }
  0x8c   : > { %469 = vmatprep.subr.mxu0 %v338_v37  ;;  %540 = vmatprep.subr.mxu1 %v340_v48  ;;  %v438_v1 = vld [vmem:[#allocation8 + $0x3c8] sm:$0xff]  ;;  %v323_v2 = vld [vmem:[#allocation8 + $0x30] sm:$0xff]  ;;  %v437_v3 = vld [vmem:[#allocation8 + $0x3c0] sm:$0xff] }
  0x8d   : > { %470 = vmatpush1.msra.mxu0 %v337_v39  ;;  %541 = vmatpush1.msra.mxu1 %v339_v50  ;;  %v320_v4 = vld [vmem:[#allocation8 + $0x18] sm:$0xff]  ;;  %v434_v5 = vld [vmem:[#allocation8 + $0x3a8] sm:$0xff]  ;;  %v319_v6 = vld [vmem:[#allocation8 + $0x10] sm:$0xff] }
  0x8e   : > { %471 = vmatprep.subr.mxu0 %v334_v41  ;;  %542 = vmatprep.subr.mxu1 %v336_v52  ;;  %v433_v7 = vld [vmem:[#allocation8 + $0x3a0] sm:$0xff]  ;;  %v444_v8 = vld [vmem:[#allocation8 + $0x3f8] sm:$0xff]  ;;  %v430_v9 = vld [vmem:[#allocation8 + $0x388] sm:$0xff] }
  0x8f   : > { %472 = vmatpush1.msra.mxu0 %v333_v43  ;;  %543 = vmatpush1.msra.mxu1 %v335_v54  ;;  %v443_v10 = vld [vmem:[#allocation8 + $0x3f0] sm:$0xff]  ;;  %v429_v11 = vld [vmem:[#allocation8 + $0x380] sm:$0xff]  ;;  %v440_v12 = vld [vmem:[#allocation8 + $0x3d8] sm:$0xff] }
  0x90   : > { %473 = vmatprep.subr.mxu0 %v330_v45  ;;  %544 = vmatprep.subr.mxu1 %v332_v56  ;;  %v426_v13 = vld [vmem:[#allocation8 + $0x368] sm:$0xff]  ;;  %v439_v14 = vld [vmem:[#allocation8 + $0x3d0] sm:$0xff]  ;;  %v425_v15 = vld [vmem:[#allocation8 + $0x360] sm:$0xff] }
  0x91   : > { %474 = vmatpush1.msra.mxu0 %v329_v47  ;;  %545 = vmatpush1.msra.mxu1 %v331_v58  ;;  %v436_v16 = vld [vmem:[#allocation8 + $0x3b8] sm:$0xff]  ;;  %v422_v17 = vld [vmem:[#allocation8 + $0x348] sm:$0xff]  ;;  %v435_v18 = vld [vmem:[#allocation8 + $0x3b0] sm:$0xff] }
  0x92   : > { %475 = vmatprep.subr.mxu0 %v326_v49  ;;  %546 = vmatprep.subr.mxu1 %v328_v60  ;;  %v421_v19 = vld [vmem:[#allocation8 + $0x340] sm:$0xff]  ;;  %v432_v20 = vld [vmem:[#allocation8 + $0x398] sm:$0xff]  ;;  %v418_v21 = vld [vmem:[#allocation8 + $0x328] sm:$0xff] }
  0x93   : > { %476 = vmatpush1.msra.mxu0 %v325_v51  ;;  %547 = vmatpush1.msra.mxu1 %v327_v62  ;;  %v431_v22 = vld [vmem:[#allocation8 + $0x390] sm:$0xff]  ;;  %v417_v23 = vld [vmem:[#allocation8 + $0x320] sm:$0xff]  ;;  %v428_v24 = vld [vmem:[#allocation8 + $0x378] sm:$0xff] }
  0x94   : > { %477 = vmatprep.subr.mxu0 %v322_v53  ;;  %548 = vmatprep.subr.mxu1 %v324_v0  ;;  %v414_v25 = vld [vmem:[#allocation8 + $0x308] sm:$0xff]  ;;  %v427_v26 = vld [vmem:[#allocation8 + $0x370] sm:$0xff]  ;;  %v413_v27 = vld [vmem:[#allocation8 + $0x300] sm:$0xff] }
  0x95   : > { %478 = vmatpush1.msra.mxu0 %v321_v55  ;;  %549 = vmatpush1.msra.mxu1 %v323_v2  ;;  %v424_v28 = vld [vmem:[#allocation8 + $0x358] sm:$0xff]  ;;  %v410_v29 = vld [vmem:[#allocation8 + $0x2e8] sm:$0xff]  ;;  %v423_v30 = vld [vmem:[#allocation8 + $0x350] sm:$0xff] }
  0x96   : > { %479 = vmatprep.subr.mxu0 %v318_v57  ;;  %550 = vmatprep.subr.mxu1 %v320_v4  ;;  %v409_v31 = vld [vmem:[#allocation8 + $0x2e0] sm:$0xff]  ;;  %v420_v32 = vld [vmem:[#allocation8 + $0x338] sm:$0xff]  ;;  %v406_v33 = vld [vmem:[#allocation8 + $0x2c8] sm:$0xff] }
  0x97   : > { %480 = vmatpush1.msra.mxu0 %v317_v59  ;;  %551 = vmatpush1.msra.mxu1 %v319_v6  ;;  %v419_v34 = vld [vmem:[#allocation8 + $0x330] sm:$0xff]  ;;  %v405_v35 = vld [vmem:[#allocation8 + $0x2c0] sm:$0xff]  ;;  %v416_v36 = vld [vmem:[#allocation8 + $0x318] sm:$0xff] }
  0x98   : > { %481 = vmatprep.subr.mxu0 %v442_v61  ;;  %552 = vmatprep.subr.mxu1 %v444_v8  ;;  %v402_v37 = vld [vmem:[#allocation8 + $0x2a8] sm:$0xff]  ;;  %v315_v38 = vld [vmem:[#allocation11] sm:$0xff]  ;;  %v415_v40 = vld [vmem:[#allocation8 + $0x310] sm:$0xff] }
  0x99   : > { %482 = vmatpush2.msra.mxu0 %v441_v63  ;;  %553 = vmatpush2.msra.mxu1 %v443_v10  ;;  %v401_v39 = vld [vmem:[#allocation8 + $0x2a0] sm:$0xff]  ;;  %v398_v41 = vld [vmem:[#allocation8 + $0x288] sm:$0xff]  ;;  %v412_v42 = vld [vmem:[#allocation8 + $0x2f8] sm:$0xff] }
  0x9a   : > { %483 = vmatprep.subr.mxu0 %v438_v1  ;;  %554 = vmatprep.subr.mxu1 %v440_v12  ;;  %v397_v43 = vld [vmem:[#allocation8 + $0x280] sm:$0xff]  ;;  %v411_v44 = vld [vmem:[#allocation8 + $0x2f0] sm:$0xff]  ;;  %v394_v45 = vld [vmem:[#allocation8 + $0x268] sm:$0xff] }
  0x9b   : > { %484 = vmatpush2.msra.mxu0 %v437_v3  ;;  %555 = vmatpush2.msra.mxu1 %v439_v14  ;;  %v408_v46 = vld [vmem:[#allocation8 + $0x2d8] sm:$0xff]  ;;  %v393_v47 = vld [vmem:[#allocation8 + $0x260] sm:$0xff]  ;;  %v407_v48 = vld [vmem:[#allocation8 + $0x2d0] sm:$0xff] }
  0x9c   : > { %485 = vmatprep.subr.mxu0 %v434_v5  ;;  %556 = vmatprep.subr.mxu1 %v436_v16  ;;  %v390_v49 = vld [vmem:[#allocation8 + $0x248] sm:$0xff]  ;;  %v404_v50 = vld [vmem:[#allocation8 + $0x2b8] sm:$0xff]  ;;  %v389_v51 = vld [vmem:[#allocation8 + $0x240] sm:$0xff] }
  0x9d   : > { %486 = vmatpush2.msra.mxu0 %v433_v7  ;;  %557 = vmatpush2.msra.mxu1 %v435_v18  ;;  %v403_v52 = vld [vmem:[#allocation8 + $0x2b0] sm:$0xff]  ;;  %v386_v53 = vld [vmem:[#allocation8 + $0x228] sm:$0xff]  ;;  %v400_v54 = vld [vmem:[#allocation8 + $0x298] sm:$0xff] }
  0x9e   : > { %487 = vmatprep.subr.mxu0 %v430_v9  ;;  %558 = vmatprep.subr.mxu1 %v432_v20  ;;  %v385_v55 = vld [vmem:[#allocation8 + $0x220] sm:$0xff]  ;;  %v399_v56 = vld [vmem:[#allocation8 + $0x290] sm:$0xff]  ;;  %v382_v57 = vld [vmem:[#allocation8 + $0x208] sm:$0xff] }
  0x9f   : > { %488 = vmatpush2.msra.mxu0 %v429_v11  ;;  %559 = vmatpush2.msra.mxu1 %v431_v22  ;;  %v396_v58 = vld [vmem:[#allocation8 + $0x278] sm:$0xff]  ;;  %v381_v59 = vld [vmem:[#allocation8 + $0x200] sm:$0xff]  ;;  %v395_v60 = vld [vmem:[#allocation8 + $0x270] sm:$0xff] }
  0xa0   : > { %489 = vmatprep.subr.mxu0 %v426_v13  ;;  %560 = vmatprep.subr.mxu1 %v428_v24  ;;  %v314_v61 = vld [vmem:[%s266_s26] sm:$0xff]  ;;  %v392_v62 = vld [vmem:[#allocation8 + $0x258] sm:$0xff]  ;;  %v391_v63 = vld [vmem:[#allocation8 + $0x250] sm:$0xff] }
  0xa1   : > { %490 = vmatpush2.msra.mxu0 %v425_v15  ;;  %561 = vmatpush2.msra.mxu1 %v427_v26  ;;  %v388_v0 = vld [vmem:[#allocation8 + $0x238] sm:$0xff]  ;;  %v387_v1 = vld [vmem:[#allocation8 + $0x230] sm:$0xff]  ;;  %v445_v4 = vld [vmem:[#allocation10] sm:$0xff] }
  0xa2   : > { %491 = vmatprep.subr.mxu0 %v422_v17  ;;  %562 = vmatprep.subr.mxu1 %v424_v28  ;;  %v384_v2 = vld [vmem:[#allocation8 + $0x218] sm:$0xff]  ;;  %v383_v3 = vld [vmem:[#allocation8 + $0x210] sm:$0xff]  ;;  %v446_v6 = vld [vmem:[#allocation10 + $0x8] sm:$0xff] }
  0xa3   : > { %492 = vmatpush2.msra.mxu0 %v421_v19  ;;  %563 = vmatpush2.msra.mxu1 %v423_v30  ;;  %v447_v12 = vld [vmem:[#allocation10 + $0x10] sm:$0xff]  ;;  %v448_v15 = vld [vmem:[#allocation10 + $0x18] sm:$0xff] }
  0xa4   : > { %493 = vmatprep.subr.mxu0 %v418_v21  ;;  %564 = vmatprep.subr.mxu1 %v420_v32 }
  0xa5   : > { %494 = vmatpush2.msra.mxu0 %v417_v23  ;;  %565 = vmatpush2.msra.mxu1 %v419_v34 }
  0xa6   : > { %495 = vmatprep.subr.mxu0 %v414_v25  ;;  %566 = vmatprep.subr.mxu1 %v416_v36  ;;  %v316_v25 = vld [vmem:[#allocation12] sm:$0xff] }
  0xa7   : > { %496 = vmatpush2.msra.mxu0 %v413_v27  ;;  %513 = vmatprep.mubr.f32.mxu0 %v315_v38 }
  0xa8   : > { %497 = vmatprep.subr.mxu0 %v410_v29  ;;  %567 = vmatpush2.msra.mxu1 %v415_v40 }
  0xa9   : > { %498 = vmatpush2.msra.mxu0 %v409_v31  ;;  %568 = vmatprep.subr.mxu1 %v412_v42 }
  0xaa   : > { %499 = vmatprep.subr.mxu0 %v406_v33  ;;  %569 = vmatpush2.msra.mxu1 %v411_v44 }
  0xab   : > { %500 = vmatpush2.msra.mxu0 %v405_v35  ;;  %570 = vmatprep.subr.mxu1 %v408_v46 }
  0xac   : > { %501 = vmatprep.subr.mxu0 %v402_v37  ;;  %571 = vmatpush2.msra.mxu1 %v407_v48 }
  0xad   : > { %502 = vmatpush2.msra.mxu0 %v401_v39  ;;  %572 = vmatprep.subr.mxu1 %v404_v50 }
  0xae   : > { %503 = vmatprep.subr.mxu0 %v398_v41  ;;  %573 = vmatpush2.msra.mxu1 %v403_v52 }
  0xaf   : > { %504 = vmatpush2.msra.mxu0 %v397_v43  ;;  %574 = vmatprep.subr.mxu1 %v400_v54 }
  0xb0   : > { %505 = vmatprep.subr.mxu0 %v394_v45  ;;  %575 = vmatpush2.msra.mxu1 %v399_v56 }
  0xb1   : > { %506 = vmatpush2.msra.mxu0 %v393_v47  ;;  %576 = vmatprep.subr.mxu1 %v396_v58 }
  0xb2   : > { %507 = vmatprep.subr.mxu0 %v390_v49  ;;  %577 = vmatpush2.msra.mxu1 %v395_v60 }
  0xb3   : > { %508 = vmatpush2.msra.mxu0 %v389_v51  ;;  %578 = vmatprep.subr.mxu1 %v392_v62 }
  0xb4   : > { %509 = vmatprep.subr.mxu0 %v386_v53  ;;  %579 = vmatpush2.msra.mxu1 %v391_v63 }
  0xb5   : > { %510 = vmatpush2.msra.mxu0 %v385_v55  ;;  %584 = vmatprep.mubr.f32.mxu1 %v315_v38 }
  0xb6   : > { %511 = vmatprep.subr.mxu0 %v382_v57  ;;  %580 = vmatprep.subr.mxu1 %v388_v0 }
  0xb7   : > { %512 = vmatpush2.msra.mxu0 %v381_v59  ;;  %581 = vmatpush2.msra.mxu1 %v387_v1 }
  0xb8   : > { %514 = vmatmul.mubr.f32.vlgmr.msra.gmra.mxu0 %v314_v61  ;;  %582 = vmatprep.subr.mxu1 %v384_v2 }
  0xb9   : > { %583 = vmatpush2.msra.mxu1 %v383_v3 }
  0xba   : > { %585 = vmatmul.mubr.f32.vlgmr.msra.gmra.mxu1 %v314_v61 }
 0x178   : > { %v515_v5 = vpop.f32.mrf.mxu0 }
 0x179   : > { %v516_v7 = vadd.f32 %v515_v5, %v445_v4 }
 0x17a   : > { %v517_v8 = vpop.f32.mrf.mxu0  ;;  %v586_v13 = vpop.f32.mrf.mxu1 }
 0x17b   : > { %v750_v9 = vmul.f32 -1.442695, %v516_v7  ;;  %v518_v10 = vadd.f32 %v517_v8, %v446_v6  ;;  %v587_v14 = vadd.f32 %v586_v13, %v447_v12 }
 0x17c   : > { %v588_v16 = vpop.f32.mrf.mxu1 }
 0x17d   : > { %855 = vpow2.f32 %v750_v9  ;;  %v751_v11 = vmul.f32 -1.442695, %v518_v10  ;;  %v752_v17 = vmul.f32 -1.442695, %v587_v14  ;;  %v589_v19 = vadd.f32 %v588_v16, %v448_v15 }
 0x17f   : > { %857 = vpow2.f32 %v751_v11 }
 0x180   : > { %859 = vpow2.f32 %v752_v17 }
 0x18a   : > { %v856_v18 = vpop.eup %855 }
 0x18b   : > { %v594_v20 = vadd.f32 1.0, %v856_v18 }
 0x18c   : > { %v858_v21 = vpop.eup %857 }
 0x18d   : > { %861 = vrcp.f32 %v594_v20  ;;  %v600_v22 = vadd.f32 1.0, %v858_v21  ;;  %v860_v23 = vpop.eup %859 }
 0x18e   : > { %863 = vtanh.f32 %v589_v19  ;;  %v606_v28 = vadd.f32 1.0, %v860_v23 }
 0x18f   : > { %865 = vrcp.f32 %v600_v22 }
 0x190   : > { %867 = vrcp.f32 %v606_v28 }
 0x19a   : > { %v862_v24 = vpop.eup %861 }
 0x19b   : > { %v864_v26 = vpop.eup %863  ;;  %v610_v29 = vmul.f32 %v862_v24, %v316_v25 }
 0x19c   : > { %v866_v27 = vpop.eup %865 }
 0x19d   : > { %v611_v30 = vmul.f32 %v866_v27, %v864_v26 }
 0x19f   : > { %v612_v31 = vadd.f32 %v611_v30, %v610_v29 }
 0x1a1   : > { %615 = vst [vmem:[#allocation12] sm:$0xff] %v612_v31  ;;  %869 = vtanh.f32 %v612_v31 }
 0x1a2   : > { %1016 = shalt.err (!%p1013_p7)
}
 0x1a3   : > { %780 = dma.vmem_to_hbm [thread:$0]  (%p811_p9), %s636_s12, 128, %s1344_s6, [#allocation13]   ;;  %v868_v32 = vpop.eup %867 }
 0x1a4   : > { %s1111_s25 = smov [#allocation11]  }
 0x1a5   : > { %s624_s24 = sshll.u32 %s1111_s25, 4  ;;  %s625_s24 = int_to_ptr.vmem [resolvable:$true] %s624_s24 }
 0x1a6   : > { %s1027_s29 = scalar_lea.vmem %s625_s24, 128  ;;  %p1034_p0 = scmp.lt.s32.totalorder %s625_s24, %s625_s24 }
 0x1a7   : > { %p1028_p3 = scmp.ne.s32.totalorder %s625_s24, %s1027_s29  ;;  %p1035_p6 = scmp.lt.s32.totalorder %s1027_s29, %s1027_s29 }
 0x1a9   : > { %p1029_p1 = pnand %p1028_p3, %p811_p9  ;;  %p1036_p5 = por %p1035_p6, %p1034_p0 }
 0x1ab   : > { %p1030_p4 = pneg %p1029_p1 }
 0x1ad   : > { %p1037_p10 = pnand %p1036_p5, %p1030_p4 }
 0x1ae   : > { %v870_v33 = vpop.eup %869 }
 0x1af   : > { %v614_v34 = vmul.f32 %v870_v33, %v868_v32 }
 0x1b1   : > { %616 = vst [vmem:[#allocation11] sm:$0xff] %v614_v34 }
 0x1b2   : > { %1040 = shalt.err (!%p1037_p10)
}
 0x1b3   : > { %778 = dma.vmem_to_hbm [thread:$0]  (%p811_p9), %s625_s24, 128, %s1343_s5, [#allocation4]  }
 0x1b4   : > { %1080 = dma.done.wait (%p811_p9), [#allocation4], 128  }
 0x1b5   : > { %1082 = vsyncadd (%p811_p9), [#allocation4], 4294967168 }
 0x1b6   : > { %1084 = dma.done.wait (%p811_p9), [#allocation13], 128  }
 0x1b7   : > { %1086 = vsyncadd (%p811_p9), [#allocation13], 4294967168 }
 0x1b8 PF: > { %p21_p11 = scmp.ge.s32.totalorder %s1235_s9, 14   ;;  %s1359_s21 = smov %s1093_s22 }
 0x1b9   : > { %s1360_s22 = smov %s1097_s23  ;;  %s1361_s23 = smov %s1247_s11 }
 0x1ba   : > { %s1362_s24 = smov %s1235_s9  ;;  %23 = sbr.rel (!%p21_p11) target bundleno = 7 (0x7), region = 105 }
 0x1bf   :  { %652 = vsyncpa [#allocation3], 1 }
 0x1c0   :  { %654 = vsyncpa [#allocation3 + $0x1], 1 }
 0x1c1   :  { %655 = vsyncpa [#allocation6], 1 }
 0x1c2   :  { %656 = vsyncpa [#allocation9], 1 }
 0x1c3   :  { %657 = vsyncpa [#allocation4], 1 }
 0x1c4   :  { %659 = vsyncpa [#allocation4 + $0x1], 1 }
 0x1c5   :  { %660 = vsyncpa [#allocation13], 1 }

</bundles_post_ra>
